<compile_context>
chip_gen: v5e
topology: v5e:2x2
jax: 0.10.0
libtpu: 0.0.40
codegen_flags: <defaults>
</compile_context>

<pallas_src>
import functools
import math

import jax
import jax.numpy as jnp
from jax.experimental import pallas as pl
from jax.experimental.pallas import tpu as pltpu

# ---------------------------------------------------------------------------
# Generation-aware VMEM budget.
# ---------------------------------------------------------------------------
try:
    _VMEM_PHYS = int(getattr(pltpu.get_tpu_info(), "vmem_capacity_bytes",
                             64 * 1024 * 1024))
except Exception:  # pragma: no cover - conservative fallback
    _VMEM_PHYS = 64 * 1024 * 1024

# ~75% of physical VMEM (96 MiB on v5e/v6e's 128 MiB, 48 MiB on v7x's 64 MiB).
VMEM_LIMIT = min(int(_VMEM_PHYS * 0.75), 100 * 1024 * 1024)
VMEM_BUDGET = int(VMEM_LIMIT * 0.85)


def _itemsize(dt):
    return jnp.dtype(dt).itemsize


def _pick_tile(dim, target, align):
    """Largest tile <= target that divides `dim` and is `align`-aligned.
    Falls back to the full dim (a full-extent block is always legal)."""
    if dim <= target:
        return dim
    t = (target // align) * align
    while t >= align:
        if dim % t == 0:
            return t
        t -= align
    return dim


def _fits_resident(tm, K, N, x_dt, w_dt, o_dt, res_dt=None):
    """Conservative VMEM estimate for the weight-resident matmul path."""
    need = 2 * K * N * _itemsize(w_dt)            # weight (double-buffered)
    need += 2 * tm * K * _itemsize(x_dt)          # activation tile
    need += 2 * tm * N * _itemsize(o_dt)          # output tile
    if res_dt is not None:
        need += 2 * tm * N * _itemsize(res_dt)    # residual tile
    need += 16 * N * 4                            # bias / gamma / beta
    need += tm * N * 4                            # in-kernel f32 intermediate
    return need <= VMEM_BUDGET


# ---------------------------------------------------------------------------
# Kernel 1a: weight-resident linear  y = x @ W + b  (optional relu)
# ---------------------------------------------------------------------------
def _linear_resident_kernel(x_ref, w_ref, b_ref, o_ref, *, act):
    y = jnp.dot(x_ref[...], w_ref[...], preferred_element_type=jnp.float32)
    y = y + b_ref[...].astype(jnp.float32)
    if act == "relu":
        y = jnp.maximum(y, 0.0)
    o_ref[...] = y.astype(o_ref.dtype)


# ---------------------------------------------------------------------------
# Kernel 1b: tiled linear fallback (grid over M, N, K with f32 accumulator).
# Used only when the weight does not fit resident (e.g. 30k-vocab head).
# ---------------------------------------------------------------------------
def _linear_tiled_kernel(x_ref, w_ref, b_ref, o_ref, acc_ref, *, act):
    k = pl.program_id(2)

    @pl.when(k == 0)
    def _():
        acc_ref[...] = jnp.zeros_like(acc_ref)

    acc_ref[...] += jnp.dot(x_ref[...], w_ref[...],
                            preferred_element_type=jnp.float32)

    @pl.when(k == pl.num_programs(2) - 1)
    def _():
        y = acc_ref[...] + b_ref[...].astype(jnp.float32)
        if act == "relu":
            y = jnp.maximum(y, 0.0)
        o_ref[...] = y.astype(o_ref.dtype)


def linear(x, w, b, act="none", out_dtype=None, tm_target=512):
    """Linear layer over the last axis of x."""
    lead = x.shape[:-1]
    K = x.shape[-1]
    N = w.shape[1]
    out_dtype = out_dtype if out_dtype is not None else x.dtype

    x2 = x.reshape(-1, K)
    if x2.dtype != w.dtype:
        x2 = x2.astype(w.dtype)
    M = x2.shape[0]
    b2 = b.reshape(1, N).astype(jnp.float32)

    # --- weight-resident path -------------------------------------------
    tm_final = None
    for t in (tm_target, 256, 128, 64, 32, 16):
        tmc = _pick_tile(M, t, 16)
        if _fits_resident(tmc, K, N, x2.dtype, w.dtype, out_dtype):
            tm_final = tmc
            break
    if tm_final is not None:
        tm = tm_final
        out = pl.pallas_call(
            functools.partial(_linear_resident_kernel, act=act),
            out_shape=jax.ShapeDtypeStruct((M, N), out_dtype),
            grid=(M // tm,),
            in_specs=[
                pl.BlockSpec((tm, K), lambda i: (i, 0)),
                pl.BlockSpec((K, N), lambda i: (0, 0)),   # resident weight
                pl.BlockSpec((1, N), lambda i: (0, 0)),
            ],
            out_specs=pl.BlockSpec((tm, N), lambda i: (i, 0)),
            compiler_params=pltpu.CompilerParams(
                dimension_semantics=("parallel",),
                vmem_limit_bytes=VMEM_LIMIT),
        )(x2, w, b2)
        return out.reshape(*lead, N)

    # --- tiled fallback (pad N to a multiple of 128 so it always tiles) ---
    Np = ((N + 127) // 128) * 128
    w_p = w if Np == N else jnp.pad(w, ((0, 0), (0, Np - N)))
    b_p = b2 if Np == N else jnp.pad(b2, ((0, 0), (0, Np - N)))

    tm = _pick_tile(M, 256, 16)
    tn = _pick_tile(Np, 512, 128)
    tk = _pick_tile(K, 512, 128)
    grid = (M // tm, Np // tn, K // tk)

    out = pl.pallas_call(
        functools.partial(_linear_tiled_kernel, act=act),
        out_shape=jax.ShapeDtypeStruct((M, Np), out_dtype),
        grid=grid,
        in_specs=[
            pl.BlockSpec((tm, tk), lambda i, j, k: (i, k)),
            pl.BlockSpec((tk, tn), lambda i, j, k: (k, j)),
            pl.BlockSpec((1, tn), lambda i, j, k: (0, j)),
        ],
        out_specs=pl.BlockSpec((tm, tn), lambda i, j, k: (i, j)),
        scratch_shapes=[pltpu.VMEM((tm, tn), jnp.float32)],
        compiler_params=pltpu.CompilerParams(
            dimension_semantics=("parallel", "parallel", "arbitrary"),
            vmem_limit_bytes=VMEM_LIMIT),
    )(x2, w_p, b_p)
    if Np != N:
        out = out[:, :N]
    return out.reshape(*lead, N)


# ---------------------------------------------------------------------------
# Kernel 2: fused  LayerNorm(residual + (x @ W + b))
# (weight-resident; used for attention out-projection + LN1 and FFN2 + LN2)
# ---------------------------------------------------------------------------
def _linear_res_ln_resident_kernel(x_ref, w_ref, b_ref, r_ref, g_ref, bb_ref,
                                   o_ref, *, eps):
    y = jnp.dot(x_ref[...], w_ref[...], preferred_element_type=jnp.float32)
    y = (y + b_ref[...].astype(jnp.float32) + r_ref[...].astype(jnp.float32))
    mean = jnp.mean(y, axis=-1, keepdims=True)
    var = jnp.mean((y - mean) ** 2, axis=-1, keepdims=True)
    yn = (y - mean) * jax.lax.rsqrt(var + eps)
    o_ref[...] = (yn * g_ref[...].astype(jnp.float32)
                  + bb_ref[...].astype(jnp.float32)).astype(o_ref.dtype)


def _linear_res_ln_tiled_kernel(x_ref, w_ref, b_ref, r_ref, g_ref, bb_ref,
                                o_ref, acc_ref, *, eps):
    k = pl.program_id(1)

    @pl.when(k == 0)
    def _():
        acc_ref[...] = jnp.zeros_like(acc_ref)

    acc_ref[...] += jnp.dot(x_ref[...], w_ref[...],
                            preferred_element_type=jnp.float32)

    @pl.when(k == pl.num_programs(1) - 1)
    def _():
        y = (acc_ref[...] + b_ref[...].astype(jnp.float32)
             + r_ref[...].astype(jnp.float32))
        mean = jnp.mean(y, axis=-1, keepdims=True)
        var = jnp.mean((y - mean) ** 2, axis=-1, keepdims=True)
        yn = (y - mean) * jax.lax.rsqrt(var + eps)
        o_ref[...] = (yn * g_ref[...].astype(jnp.float32)
                      + bb_ref[...].astype(jnp.float32)).astype(o_ref.dtype)


def linear_residual_layernorm(x, w, b, res, gamma, beta, eps=1e-5,
                              out_dtype=None, tm_target=512):
    """LN(res + x @ W + b), LN fused into the matmul epilogue.
    The output feature dim N is the full LN axis (kept untiled)."""
    lead = x.shape[:-1]
    K = x.shape[-1]
    N = w.shape[1]
    out_dtype = out_dtype if out_dtype is not None else x.dtype

    x2 = x.reshape(-1, K)
    if x2.dtype != w.dtype:
        x2 = x2.astype(w.dtype)
    M = x2.shape[0]
    r2 = res.reshape(M, N)
    b2 = b.reshape(1, N).astype(jnp.float32)
    g2 = gamma.reshape(1, N).astype(jnp.float32)
    bb2 = beta.reshape(1, N).astype(jnp.float32)

    # --- weight-resident path -------------------------------------------
    tm_final = None
    for t in (tm_target, 256, 128, 64, 32, 16):
        tmc = _pick_tile(M, t, 16)
        if _fits_resident(tmc, K, N, x2.dtype, w.dtype, out_dtype,
                          res_dt=r2.dtype):
            tm_final = tmc
            break
    if tm_final is not None:
        tm = tm_final
        out = pl.pallas_call(
            functools.partial(_linear_res_ln_resident_kernel, eps=eps),
            out_shape=jax.ShapeDtypeStruct((M, N), out_dtype),
            grid=(M // tm,),
            in_specs=[
                pl.BlockSpec((tm, K), lambda i: (i, 0)),   # x
                pl.BlockSpec((K, N), lambda i: (0, 0)),    # W (resident)
                pl.BlockSpec((1, N), lambda i: (0, 0)),    # b
                pl.BlockSpec((tm, N), lambda i: (i, 0)),   # residual
                pl.BlockSpec((1, N), lambda i: (0, 0)),    # gamma
                pl.BlockSpec((1, N), lambda i: (0, 0)),    # beta
            ],
            out_specs=pl.BlockSpec((tm, N), lambda i: (i, 0)),
            compiler_params=pltpu.CompilerParams(
                dimension_semantics=("parallel",),
                vmem_limit_bytes=VMEM_LIMIT),
        )(x2, w, b2, r2, g2, bb2)
        return out.reshape(*lead, N)

    # --- tiled-K fallback --------------------------------------------------
    tm = _pick_tile(M, 256, 16)
    tk = _pick_tile(K, 512, 128)
    grid = (M // tm, K // tk)
    out = pl.pallas_call(
        functools.partial(_linear_res_ln_tiled_kernel, eps=eps),
        out_shape=jax.ShapeDtypeStruct((M, N), out_dtype),
        grid=grid,
        in_specs=[
            pl.BlockSpec((tm, tk), lambda i, k: (i, k)),
            pl.BlockSpec((tk, N), lambda i, k: (k, 0)),
            pl.BlockSpec((1, N), lambda i, k: (0, 0)),
            pl.BlockSpec((tm, N), lambda i, k: (i, 0)),
            pl.BlockSpec((1, N), lambda i, k: (0, 0)),
            pl.BlockSpec((1, N), lambda i, k: (0, 0)),
        ],
        out_specs=pl.BlockSpec((tm, N), lambda i, k: (i, 0)),
        scratch_shapes=[pltpu.VMEM((tm, N), jnp.float32)],
        compiler_params=pltpu.CompilerParams(
            dimension_semantics=("parallel", "arbitrary"),
            vmem_limit_bytes=VMEM_LIMIT),
    )(x2, w, b2, r2, g2, bb2)
    return out.reshape(*lead, N)


# ---------------------------------------------------------------------------
# Kernel 3: multi-head self-attention from the fused (B, S, 3D) QKV activation
# ---------------------------------------------------------------------------
def _mha_group_kernel(q_ref, k_ref, v_ref, bias_ref, o_ref, *,
                      heads_per_group, head_dim, scale):
    """One (batch, head-group) block: q/k/v are (1, S, gw) lane-dense slices."""
    bias = bias_ref[0].astype(jnp.float32)        # (1, S)
    outs = []
    for hh in range(heads_per_group):             # static unroll (<= 2)
        sl = slice(hh * head_dim, (hh + 1) * head_dim)
        qh = q_ref[0, :, sl]
        kh = k_ref[0, :, sl]
        vh = v_ref[0, :, sl]
        s = jax.lax.dot_general(qh, kh, (((1,), (1,)), ((), ())),
                                preferred_element_type=jnp.float32)
        s = s * scale + bias
        m = jnp.max(s, axis=-1, keepdims=True)
        p = jnp.exp(s - m)
        p = p * pl.reciprocal(jnp.sum(p, axis=-1, keepdims=True), approx=True)
        outs.append(jnp.dot(p.astype(vh.dtype), vh,
                            preferred_element_type=jnp.float32))
    blk = outs[0] if len(outs) == 1 else jnp.concatenate(outs, axis=-1)
    o_ref[0] = blk.astype(o_ref.dtype)            # single lane-dense store


def _mha_full_kernel(qkv_ref, bias_ref, o_ref, *, n_heads, scale):
    """Fallback: whole (S, 3D) slab for one batch element (small/toy shapes)."""
    D3 = qkv_ref.shape[2]
    D = D3 // 3
    dh = D // n_heads
    store_w = D if D <= 128 else 128
    heads_per_store = max(1, store_w // dh)

    qkv = qkv_ref[0]                               # (S, 3D)
    bias = bias_ref[0].astype(jnp.float32)         # (1, S)

    chunk, off = [], 0
    for h in range(n_heads):                       # static unroll
        qh = qkv[:, h * dh:(h + 1) * dh]
        kh = qkv[:, D + h * dh:D + (h + 1) * dh]
        vh = qkv[:, 2 * D + h * dh:2 * D + (h + 1) * dh]
        s = jax.lax.dot_general(qh, kh, (((1,), (1,)), ((), ())),
                                preferred_element_type=jnp.float32)
        s = s * scale + bias
        m = jnp.max(s, axis=-1, keepdims=True)
        p = jnp.exp(s - m)
        p = p * pl.reciprocal(jnp.sum(p, axis=-1, keepdims=True), approx=True)
        chunk.append(jnp.dot(p.astype(vh.dtype), vh,
                             preferred_element_type=jnp.float32))
        if len(chunk) == heads_per_store or h == n_heads - 1:
            blk = chunk[0] if len(chunk) == 1 else jnp.concatenate(chunk, -1)
            cw = blk.shape[-1]
            if cw == D:
                o_ref[0] = blk.astype(o_ref.dtype)
            else:
                o_ref[0, :, off:off + cw] = blk.astype(o_ref.dtype)
            off += cw
            chunk = []


def multi_head_attention_from_qkv(qkv, attn_bias, n_heads):
    """qkv: (B, S, 3D) fused projections; attn_bias: (B, 1, S) additive."""
    B, S, D3 = qkv.shape
    D = D3 // 3
    dh = D // n_heads
    scale = 1.0 / math.sqrt(dh)

    # Head-group width: each grid block covers a 128-lane multiple of heads so
    # the DMA does the per-head slicing and stores are unmasked & lane-dense.
    gw = None
    if dh % 128 == 0:
        gw = dh
    elif (128 % dh == 0) and (D % 128 == 0):
        gw = 128

    # TODO(synk): add flash-style KV tiling (online softmax) for S > ~1024;
    # both paths below materialize the full (S, S) f32 score matrix per head.
    if gw is not None:
        G = D // gw
        hpg = gw // dh
        return pl.pallas_call(
            functools.partial(_mha_group_kernel, heads_per_group=hpg,
                              head_dim=dh, scale=scale),
            out_shape=jax.ShapeDtypeStruct((B, S, D), qkv.dtype),
            grid=(B, G),
            in_specs=[
                pl.BlockSpec((1, S, gw), lambda b, g: (b, 0, g)),
                pl.BlockSpec((1, S, gw), lambda b, g: (b, 0, D // gw + g)),
                pl.BlockSpec((1, S, gw), lambda b, g: (b, 0, 2 * D // gw + g)),
                pl.BlockSpec((1, 1, S), lambda b, g: (b, 0, 0)),
            ],
            out_specs=pl.BlockSpec((1, S, gw), lambda b, g: (b, 0, g)),
            compiler_params=pltpu.CompilerParams(
                dimension_semantics=("parallel", "parallel"),
                vmem_limit_bytes=VMEM_LIMIT),
        )(qkv, qkv, qkv, attn_bias)

    # Fallback for toy / non-128-packable head sizes.
    return pl.pallas_call(
        functools.partial(_mha_full_kernel, n_heads=n_heads, scale=scale),
        out_shape=jax.ShapeDtypeStruct((B, S, D), qkv.dtype),
        grid=(B,),
        in_specs=[
            pl.BlockSpec((1, S, D3), lambda b: (b, 0, 0)),
            pl.BlockSpec((1, 1, S), lambda b: (b, 0, 0)),
        ],
        out_specs=pl.BlockSpec((1, S, D), lambda b: (b, 0, 0)),
        compiler_params=pltpu.CompilerParams(
            dimension_semantics=("parallel",),
            vmem_limit_bytes=VMEM_LIMIT),
    )(qkv, attn_bias)


# ---------------------------------------------------------------------------
# Model glue (plain JAX: embedding gather, PE table, parameter bookkeeping)
# ---------------------------------------------------------------------------
def sinusoidal_pe(length, d_model):
    pos = jnp.arange(length, dtype=jnp.float32)[:, None]
    i = jnp.arange(0, d_model, 2, dtype=jnp.float32)
    div = jnp.exp(-math.log(10000.0) * i / d_model)
    pe = jnp.zeros((length, d_model), jnp.float32)
    pe = pe.at[:, 0::2].set(jnp.sin(pos * div))
    pe = pe.at[:, 1::2].set(jnp.cos(pos * div))
    return pe


def encoder_layer(x, p, attn_bias, n_heads):
    # Fused QKV projection: one matmul with N = 3*D, bf16 in/out.
    qkv = linear(x, p["wqkv"], p["bqkv"], out_dtype=jnp.bfloat16)
    attn = multi_head_attention_from_qkv(qkv, attn_bias, n_heads)
    # out-projection + residual + LN1 fused.
    x = linear_residual_layernorm(attn, p["wo"], p["bo"], x,
                                  p["ln1_g"], p["ln1_b"],
                                  out_dtype=jnp.bfloat16)
    # FFN: W1 + relu, then W2 + residual + LN2 fused.
    ff = linear(x, p["w1"], p["b1"], act="relu", out_dtype=jnp.bfloat16)
    x = linear_residual_layernorm(ff, p["w2"], p["b2"], x,
                                  p["ln2_g"], p["ln2_b"],
                                  out_dtype=jnp.bfloat16)
    return x


def bert_forward(params, tokens, n_heads, lengths=None):
    B, S = tokens.shape
    D = params["embedding"].shape[1]
    if lengths is not None:
        valid = jnp.arange(S)[None, :] < lengths[:, None]   # generate_padding_mask
    else:
        valid = jnp.ones((B, S), dtype=bool)
    attn_bias = jnp.where(valid, 0.0, -1e9).astype(jnp.float32).reshape(B, 1, S)

    # TODO(synk): embedding gather stays in plain JAX (jnp.take); no clean
    # small-scale Pallas gather for this pattern.
    x = jnp.take(params["embedding"], tokens, axis=0).astype(jnp.float32)
    x = x + sinusoidal_pe(S, D)[None, :, :]
    x = x.astype(jnp.bfloat16)                               # bf16 activations
    for lp in params["layers"]:
        x = encoder_layer(x, lp, attn_bias, n_heads)
    logits = linear(x, params["wc"], params["bc"],
                    out_dtype=jnp.float32)                   # (B, S, n_tokens)
    return logits


def init_params(key, n_tokens, n_layers, d_model, d_ff):
    # Weights stored in bf16 (halves HBM traffic); biases / LN params in f32.
    def norm(k, shape, scale=0.02):
        return (scale * jax.random.normal(k, shape, jnp.float32)
                ).astype(jnp.bfloat16)

    keys = jax.random.split(key, 2 + n_layers)
    params = {
        "embedding": norm(keys[0], (n_tokens, d_model)),
        "wc": norm(keys[1], (d_model, n_tokens)),
        "bc": jnp.zeros((n_tokens,), jnp.float32),
        "layers": [],
    }
    for li in range(n_layers):
        lk = jax.random.split(keys[2 + li], 4)
        params["layers"].append({
            # fused Q|K|V weight (D, 3D)
            "wqkv": norm(lk[0], (d_model, 3 * d_model)),
            "bqkv": jnp.zeros((3 * d_model,), jnp.float32),
            "wo": norm(lk[1], (d_model, d_model)),
            "bo": jnp.zeros((d_model,), jnp.float32),
            "w1": norm(lk[2], (d_model, d_ff)),
            "b1": jnp.zeros((d_ff,), jnp.float32),
            "w2": norm(lk[3], (d_ff, d_model)),
            "b2": jnp.zeros((d_model,), jnp.float32),
            "ln1_g": jnp.ones((d_model,), jnp.float32),
            "ln1_b": jnp.zeros((d_model,), jnp.float32),
            "ln2_g": jnp.ones((d_model,), jnp.float32),
            "ln2_b": jnp.zeros((d_model,), jnp.float32),
        })
    return params


if __name__ == "__main__":
    n_tokens, n_layers, d_model, n_heads = 64, 2, 32, 4
    d_ff = 4 * d_model
    B, S = 2, 8

    key = jax.random.PRNGKey(0)
    pkey, tkey = jax.random.split(key)
    params = init_params(pkey, n_tokens, n_layers, d_model, d_ff)
    tokens = jax.random.randint(tkey, (B, S), 0, n_tokens, dtype=jnp.int32)
    lengths = jnp.array([S, 5], dtype=jnp.int32)

    logits = bert_forward(params, tokens, n_heads, lengths)
    jax.block_until_ready(logits)
    assert logits.shape == (B, S, n_tokens), logits.shape
    assert jnp.all(jnp.isfinite(logits))
    print("KERNEL_OK")
</pallas_src>

<mosaic_0001>
module attributes {stable_mosaic.version = 11 : i64} {
  func.func @_linear_resident_kernel(%arg0: i32, %arg1: memref<16x32xbf16, #tpu.memory_space<vmem>>, %arg2: memref<32x96xbf16, #tpu.memory_space<vmem>>, %arg3: memref<1x96xf32, #tpu.memory_space<vmem>>, %arg4: memref<16x96xbf16, #tpu.memory_space<vmem>>) attributes {dimension_semantics = [#tpu.dimension_semantics<parallel>], iteration_bounds = array<i64: 1>, scalar_prefetch = 0 : i64, scratch_operands = 0 : i64, tpu.core_type = #tpu.core_type<tc>, window_params = [{transform_indices = @transform_0, window_bounds = array<i64: 16, 32>}, {pipeline_mode = #tpu.pipeline_mode<synchronous>, transform_indices = @transform_1, window_bounds = array<i64: 32, 96>}, {pipeline_mode = #tpu.pipeline_mode<synchronous>, transform_indices = @transform_2, window_bounds = array<i64: 1, 96>}, {transform_indices = @transform_3, window_bounds = array<i64: 16, 96>}]} {
    %c0 = arith.constant 0 : index
    %c0_0 = arith.constant 0 : index
    %0 = vector.load %arg1[%c0, %c0_0] : memref<16x32xbf16, #tpu.memory_space<vmem>>, vector<16x32xbf16>
    %c0_1 = arith.constant 0 : index
    %c0_2 = arith.constant 0 : index
    %1 = vector.load %arg2[%c0_1, %c0_2] : memref<32x96xbf16, #tpu.memory_space<vmem>>, vector<32x96xbf16>
    %cst = arith.constant dense<0.000000e+00> : vector<16x96xf32>
    %2 = tpu.matmul %0, %1, %cst {dimension_numbers = #tpu.dot_dimension_numbers<[1], [0], [0], [1], [0, 0, 1, 1], [], []>} : vector<16x32xbf16>, vector<32x96xbf16>, vector<16x96xf32> -> vector<16x96xf32>
    %c0_3 = arith.constant 0 : index
    %c0_4 = arith.constant 0 : index
    %3 = vector.load %arg3[%c0_3, %c0_4] : memref<1x96xf32, #tpu.memory_space<vmem>>, vector<1x96xf32>
    %4 = vector.broadcast %3 : vector<1x96xf32> to vector<16x96xf32>
    %5 = arith.addf %2, %4 : vector<16x96xf32>
    %6 = arith.truncf %5 : vector<16x96xf32> to vector<16x96xbf16>
    %c0_5 = arith.constant 0 : index
    %c0_6 = arith.constant 0 : index
    %7 = vector.load %arg4[%c0_5, %c0_6] : memref<16x96xbf16, #tpu.memory_space<vmem>>, vector<16x96xbf16>
    tpu.vector_store %arg4[%c0_5, %c0_6], %6 {strides = array<i32>} : memref<16x96xbf16, #tpu.memory_space<vmem>>, vector<16x96xbf16>,
    return
  }
  func.func @transform_0(%arg0: i32) -> (i32, i32) {
    %c0_i32 = arith.constant 0 : i32
    %c0_i32_0 = arith.constant 0 : i32
    return %arg0, %c0_i32 : i32, i32
  }
  func.func @transform_1(%arg0: i32) -> (i32, i32) {
    %c0_i32 = arith.constant 0 : i32
    %c0_i32_0 = arith.constant 0 : i32
    %c0_i32_1 = arith.constant 0 : i32
    return %c0_i32, %c0_i32_0 : i32, i32
  }
  func.func @transform_2(%arg0: i32) -> (i32, i32) {
    %c0_i32 = arith.constant 0 : i32
    %c0_i32_0 = arith.constant 0 : i32
    %c0_i32_1 = arith.constant 0 : i32
    return %c0_i32, %c0_i32_0 : i32, i32
  }
  func.func @transform_3(%arg0: i32) -> (i32, i32) {
    %c0_i32 = arith.constant 0 : i32
    %c0_i32_0 = arith.constant 0 : i32
    return %arg0, %c0_i32 : i32, i32
  }
}

</mosaic_0001>

<bundles_post_ra>
// kernel: tpu_custom_call.1
= control target key start
LH: loop header
LB: loop body
LE: loop exit
PB: predicated region body
PF: predicated region fallthrough
CT: control target
= control target key end

     0   :  { %8 = vsyncpa [#allocation3], 0  ;;  %s264_s0 = inlined_call_operand.hbm [shape: bf16[16,32], index: 0, kind: input, shape index: {}]   ;;  %s265_s1 = inlined_call_operand.hbm [shape: bf16[32,96], index: 1, kind: input, shape index: {}]   ;;  %s266_s2 = inlined_call_operand.vmem [shape: f32[1,96], index: 2, kind: input, shape index: {}]   ;;  %s267_s3 = inlined_call_operand.hbm [shape: bf16[16,96], index: 3, kind: output, shape index: {}]  }
   0x1   :  { %9 = vsyncpa [#allocation6], 0 }
   0x2   :  { %10 = vsyncpa [#allocation4], 0  ;;  %s15_s14 = sshll.u32 %s264_s0, 4  ;;  %s218_s15 = smov [#allocation2]   ;;  %s16_s14 = int_to_ptr.hbm [resolvable:$true] %s15_s14 }
   0x3   :  { %s17_s16 = sshll.u32 %s218_s15, 4  ;;  %s28_s19 = sshll.u32 %s265_s1, 4  ;;  %s18_s16 = int_to_ptr.vmem [resolvable:$true] %s17_s16  ;;  %s29_s19 = int_to_ptr.hbm [resolvable:$true] %s28_s19 }
   0x4   :  { %s219_s20 = smov 64   ;;  %s220_s21 = smov 4  }
   0x5   :  { %23 = dma.hbm_to_vmem [thread:$0]  %s16_s14, 128, %s18_s16, [#allocation3], %s219_s20, %s219_s20, %s220_s21  }
   0x6   :  { %s221_s22 = smov [#allocation5]  }
   0x7   :  { %s30_s23 = sshll.u32 %s221_s22, 4  ;;  %s31_s23 = int_to_ptr.vmem [resolvable:$true] %s30_s23 }
   0x8   :  { %36 = dma.hbm_to_vmem [thread:$0]  %s29_s19, 256, %s31_s23, [#allocation6], %s219_s20, %s219_s20, %s220_s21  }
   0x9   :  { %212 = dma.done.wait [#allocation3], 128  }
   0xa   :  { %213 = vsyncadd [#allocation3], 4294967168 }
   0xb   :  { %214 = dma.done.wait [#allocation6], 256  }
   0xc   :  { %215 = vsyncadd [#allocation6], 4294967040  ;;  %v133_v0 = vld [vmem:[#allocation5 + $0x8] sm:$0xff]  ;;  %v132_v1 = vld [vmem:[#allocation5] sm:$0xff]  ;;  %vm75_vm0 = vcmask 261120   ;;  %vm95_vm1 = vcmask 781312  }
   0xd   :  { %85 = vmatpush.bf16.msra.mxu0 %v133_v0  ;;  %v131_v2 = vld [vmem:[#allocation2] sm:$0xff]  ;;  %s222_s24 = smov [#allocation7]   ;;  %s104_s28 = sshll.u32 %s267_s3, 4  ;;  %s105_s28 = int_to_ptr.hbm [resolvable:$true] %s104_s28 }
   0xe   :  { %v139_v3 = vld [vmem:[%s266_s2] ss:$0 sm:$0xff]  ;;  %s102_s25 = sshll.u32 %s222_s24, 4  ;;  %s103_s25 = int_to_ptr.vmem [resolvable:$true] %s102_s25 }
  0x11   :  { %86 = vmatpush.bf16.msra.mxu0 %v132_v1 }
  0x14   :  { %130 = vmatmul.msk.bf16.vlgmr.msra.gmra.mxu0 %vm75_vm0, %v131_v2 }
  0x91   :  { %v88_v4 = vpop.f32.mrf.mxu0 }
  0x92   :  { %v89_v5 = vadd.f32 %v139_v3, %v88_v4 }
  0x94   :  { %v93_v6 = vpack.c.bf16 %v89_v5, %v89_v5 }
  0x96   :  { %96 = vst.msk [vmem:[#allocation7] sm:$0xf] %vm95_vm1, %v93_v6 }
  0x99   :  { %v90_v7 = vpop.f32.mrf.mxu0 }
  0x9a   :  { %v91_v8 = vadd.f32 %v139_v3, %v90_v7 }
  0x9c   :  { %v94_v9 = vpack.c.bf16 %v91_v8, %v91_v8 }
  0x9e   :  { %97 = vst.msk [vmem:[#allocation7 + $0x4] sm:$0xf] %vm95_vm1, %v94_v9 }
  0x9f   :  { %110 = dma.vmem_to_hbm [thread:$0]  %s103_s25, 128, %s105_s28, [#allocation4], %s219_s20, %s219_s20, %s220_s21  }
  0xa0   :  { %216 = dma.done.wait [#allocation4], 128  }
  0xa1   :  { %217 = vsyncadd [#allocation4], 4294967168 }
  0xa2   :  { %115 = vsyncpa [#allocation3], 1 }
  0xa3   :  { %116 = vsyncpa [#allocation6], 1 }
  0xa4   :  { %117 = vsyncpa [#allocation4], 1 }

</bundles_post_ra>
